<compile_context>
chip_gen: v5e
topology: v5e:2x2
jax: 0.10.0
libtpu: 0.0.40
codegen_flags: <defaults>
</compile_context>

<pallas_src>
import jax
import jax.numpy as jnp
from jax.experimental import pallas as pl
from jax.experimental.pallas import tpu as pltpu


def attention_kernel(x_ref, w1_ref, b1_ref, w2_ref, ctx_ref, attn_ref):
    # x_ref: (TB, S, H); w1_ref: (H, 64); b1_ref: (1, 64); w2_ref: (1, 64)
    TB, S, H = x_ref.shape
    x = x_ref[...]                                            # (TB, S, H) f32

    # Linear(H, 64) + tanh: all TB*S rows batched into one MXU matmul.  The
    # (TB,S,H)->(TB*S,H) reshape is a free sublane re-tiling when S % 8 == 0.
    # TODO(synk): for S % 8 != 0 this reshape materializes a VMEM copy; pad S
    # (or tile S with an online softmax) if that shows up in the bundle dump.
    h = jnp.tanh(
        jnp.dot(x.reshape(TB * S, H), w1_ref[...],
                preferred_element_type=jnp.float32)
        + b1_ref[...]
    )                                                         # (TB*S, 64)

    # Linear(64, 1): reduce over the 64 hidden units against w2 laid out as a
    # (1, 64) row -> lane-major scores (sequence on lanes).  b2 is omitted:
    # softmax(s + c) == softmax(s) and the raw scores are never returned.
    scores = jnp.sum(h.reshape(TB, S, 64) * w2_ref[...], axis=-1)   # (TB, S)

    # Numerically stable softmax over the sequence (lane) axis.
    m = jnp.max(scores, axis=-1, keepdims=True)               # (TB, 1)
    e = jnp.exp(scores - m)                                   # (TB, S)
    w = e * pl.reciprocal(jnp.sum(e, axis=-1, keepdims=True), approx=False)

    # Context on the VPU/XLU: broadcast the per-(batch, seq) weight over the
    # H lanes and reduce over the sequence (sublane) axis.
    ctx = jnp.sum(x * w[:, :, None], axis=1)                  # (TB, H)

    ctx_ref[...] = ctx.astype(ctx_ref.dtype)
    attn_ref[...] = w.astype(attn_ref.dtype)                  # (TB, S) lane-dense


def _pick_block_batch(B, S, H, *, dtype_bytes=4, target_bytes=4 << 20):
    """Choose TB (batch rows per grid step), sized by bytes.

    Constraints:
      * TB divides B exactly.
      * TB == B, or TB is a multiple of 8 (so the (TB, H) / (TB, S) output
        blocks keep a multiple-of-8 second-minor dim: no (8,128) lowering
        hazard, unmasked full-width stores).
    Preference: largest TB whose x block (TB*S*H*dtype_bytes) fits the
    per-step byte budget; whole batch in one step when it already fits.
    """
    row_bytes = max(1, S * H * dtype_bytes)
    if B * row_bytes <= target_bytes:
        return B                                   # single grid step
    mult8_divs = [d for d in range(8, B, 8) if B % d == 0]
    fitting = [d for d in mult8_divs if d * row_bytes <= target_bytes]
    if fitting:
        return max(fitting)
    if mult8_divs:
        # Even the smallest legal tile exceeds the budget (huge S*H rows);
        # take it anyway — it is the smallest tile we can express without
        # tiling S.  TODO(synk): add an S-tiled (online-softmax) path for
        # rows approaching v7x's 64 MiB VMEM.
        return min(mult8_divs)
    return B                                       # no multiple-of-8 divisor


def attention_layer(x, w1, b1, w2, b2):
    """x: [B, S, H] f32.  Returns (context [B, H], attention_weights [B, S, 1])."""
    B, S, H = x.shape
    del b2  # no-op for both outputs (softmax shift invariance); not sent to TPU
    tb = _pick_block_batch(B, S, H)

    x = x.astype(jnp.float32)
    w1 = w1.astype(jnp.float32)
    b1_2d = b1.reshape(1, 64).astype(jnp.float32)
    w2_row = w2.reshape(1, 64).astype(jnp.float32)   # (64,1) flattened to lanes

    # Explicit scoped-VMEM limit: enough for double-buffered x blocks plus the
    # hidden activations, capped at 48 MiB (under v7x's 64 MiB per-core VMEM,
    # above the 16/32 MiB scoped defaults on v5e/v6e/v7x).
    x_blk = tb * S * H * 4
    h_blk = tb * S * 64 * 4
    out_blk = (tb * H + tb * S) * 4
    weights = (H * 64 + 128) * 4
    vmem_limit = int(min(max(2 * x_blk + 2 * out_blk + 4 * h_blk + weights,
                             32 << 20), 48 << 20))

    def const_spec(shape):
        # Grid-invariant operands: single-buffered to save VMEM headroom.
        return pl.BlockSpec(shape, lambda b: (0, 0),
                            pipeline_mode=pl.Buffered(1))

    # TODO(synk): on v7x (2 TCs) prefer an even grid step count so both cores
    # get equal work under dimension_semantics=("parallel",).
    grid_spec = pltpu.PrefetchScalarGridSpec(
        num_scalar_prefetch=0,
        grid=(B // tb,),
        in_specs=[
            pl.BlockSpec((tb, S, H), lambda b: (b, 0, 0)),    # x (pipelined)
            const_spec((H, 64)),                              # w1
            const_spec((1, 64)),                              # b1
            const_spec((1, 64)),                              # w2 (row layout)
        ],
        out_specs=[
            pl.BlockSpec((tb, H), lambda b: (b, 0)),          # context
            pl.BlockSpec((tb, S), lambda b: (b, 0)),          # attn (lane-dense)
        ],
    )

    ctx, attn = pl.pallas_call(
        attention_kernel,
        out_shape=(
            jax.ShapeDtypeStruct((B, H), jnp.float32),
            jax.ShapeDtypeStruct((B, S), jnp.float32),
        ),
        grid_spec=grid_spec,
        compiler_params=pltpu.CompilerParams(
            dimension_semantics=("parallel",),
            vmem_limit_bytes=vmem_limit,
        ),
    )(x, w1, b1_2d, w2_row)

    # Free layout plumbing back to the PyTorch (B, S, 1) shape.
    return ctx, attn.reshape(B, S, 1)


def attention_layer_ref(x, w1, b1, w2, b2):
    """Pure-JAX reference mirroring the PyTorch forward."""
    scores = jnp.tanh(x @ w1 + b1) @ w2 + b2                  # (B, S, 1)
    attn = jax.nn.softmax(scores, axis=1)
    ctx = jnp.sum(x * attn, axis=1)
    return ctx, attn


if __name__ == "__main__":
    B, S, H = 2, 8, 32   # batch, sequence, hidden_size

    key = jax.random.PRNGKey(0)
    kx, k1, k2, k3, k4 = jax.random.split(key, 5)

    # Deterministic init (shapes match nn.Linear(H, 64) and nn.Linear(64, 1)).
    x = jax.random.normal(kx, (B, S, H), dtype=jnp.float32)
    w1 = jax.random.normal(k1, (H, 64), dtype=jnp.float32) * 0.1
    b1 = jax.random.normal(k2, (64,), dtype=jnp.float32) * 0.1
    w2 = jax.random.normal(k3, (64, 1), dtype=jnp.float32) * 0.1
    b2 = jax.random.normal(k4, (1,), dtype=jnp.float32) * 0.1

    ctx, attn = attention_layer(x, w1, b1, w2, b2)
    jax.block_until_ready((ctx, attn))

    ctx_ref, attn_ref = attention_layer_ref(x, w1, b1, w2, b2)
    assert ctx.shape == (B, H) and attn.shape == (B, S, 1)
    assert jnp.allclose(ctx, ctx_ref, atol=1e-5, rtol=1e-5)
    assert jnp.allclose(attn, attn_ref, atol=1e-5, rtol=1e-5)

    print("KERNEL_OK")
</pallas_src>

<mosaic_0001>
module attributes {stable_mosaic.version = 11 : i64} {
  func.func @attention_kernel(%arg0: i32, %arg1: memref<2x8x32xf32, #tpu.memory_space<vmem>>, %arg2: memref<32x64xf32, #tpu.memory_space<vmem>>, %arg3: memref<1x64xf32, #tpu.memory_space<vmem>>, %arg4: memref<1x64xf32, #tpu.memory_space<vmem>>, %arg5: memref<2x32xf32, #tpu.memory_space<vmem>>, %arg6: memref<2x8xf32, #tpu.memory_space<vmem>>) attributes {dimension_semantics = [#tpu.dimension_semantics<parallel>], iteration_bounds = array<i64: 1>, scalar_prefetch = 0 : i64, scratch_operands = 0 : i64, tpu.core_type = #tpu.core_type<tc>, window_params = [{transform_indices = @transform_0, window_bounds = array<i64: 2, 8, 32>}, {pipeline_mode = #tpu.pipeline_mode<synchronous>, transform_indices = @transform_1, window_bounds = array<i64: 32, 64>}, {pipeline_mode = #tpu.pipeline_mode<synchronous>, transform_indices = @transform_2, window_bounds = array<i64: 1, 64>}, {pipeline_mode = #tpu.pipeline_mode<synchronous>, transform_indices = @transform_3, window_bounds = array<i64: 1, 64>}, {transform_indices = @transform_4, window_bounds = array<i64: 2, 32>}, {transform_indices = @transform_5, window_bounds = array<i64: 2, 8>}]} {
    %c0 = arith.constant 0 : index
    %c0_0 = arith.constant 0 : index
    %c0_1 = arith.constant 0 : index
    %0 = vector.load %arg1[%c0, %c0_0, %c0_1] : memref<2x8x32xf32, #tpu.memory_space<vmem>>, vector<2x8x32xf32>
    %1 = vector.shape_cast %0 : vector<2x8x32xf32> to vector<16x32xf32>
    %c0_2 = arith.constant 0 : index
    %c0_3 = arith.constant 0 : index
    %2 = vector.load %arg2[%c0_2, %c0_3] : memref<32x64xf32, #tpu.memory_space<vmem>>, vector<32x64xf32>
    %cst = arith.constant dense<0.000000e+00> : vector<16x64xf32>
    %3 = tpu.matmul %1, %2, %cst {dimension_numbers = #tpu.dot_dimension_numbers<[1], [0], [0], [1], [0, 0, 1, 1], [], []>} : vector<16x32xf32>, vector<32x64xf32>, vector<16x64xf32> -> vector<16x64xf32>
    %c0_4 = arith.constant 0 : index
    %c0_5 = arith.constant 0 : index
    %4 = vector.load %arg3[%c0_4, %c0_5] : memref<1x64xf32, #tpu.memory_space<vmem>>, vector<1x64xf32>
    %5 = vector.broadcast %4 : vector<1x64xf32> to vector<16x64xf32>
    %6 = arith.addf %3, %5 : vector<16x64xf32>
    %7 = math.tanh %6 : vector<16x64xf32>
    %8 = vector.shape_cast %7 : vector<16x64xf32> to vector<2x8x64xf32>
    %c0_6 = arith.constant 0 : index
    %c0_7 = arith.constant 0 : index
    %9 = vector.load %arg4[%c0_6, %c0_7] : memref<1x64xf32, #tpu.memory_space<vmem>>, vector<1x64xf32>
    %10 = vector.shape_cast %9 : vector<1x64xf32> to vector<1x1x64xf32>
    %11 = vector.broadcast %10 : vector<1x1x64xf32> to vector<2x8x64xf32>
    %12 = arith.mulf %8, %11 : vector<2x8x64xf32>
    %cst_8 = arith.constant dense<0.000000e+00> : vector<2x8xf32>
    %13 = vector.multi_reduction <add>, %12, %cst_8 [2] : vector<2x8x64xf32> to vector<2x8xf32>
    %cst_9 = arith.constant dense<0xFF800000> : vector<2xf32>
    %14 = vector.multi_reduction <maximumf>, %13, %cst_9 [1] : vector<2x8xf32> to vector<2xf32>
    %15 = vector.shape_cast %14 : vector<2xf32> to vector<2x1xf32>
    %16 = vector.broadcast %15 : vector<2x1xf32> to vector<2x8xf32>
    %17 = arith.subf %13, %16 : vector<2x8xf32>
    %18 = math.exp %17 : vector<2x8xf32>
    %cst_10 = arith.constant dense<0.000000e+00> : vector<2xf32>
    %19 = vector.multi_reduction <add>, %18, %cst_10 [1] : vector<2x8xf32> to vector<2xf32>
    %20 = vector.shape_cast %19 : vector<2xf32> to vector<2x1xf32>
    %21 = tpu.reciprocal %20 : vector<2x1xf32> -> vector<2x1xf32>
    %22 = vector.broadcast %21 : vector<2x1xf32> to vector<2x8xf32>
    %23 = arith.mulf %18, %22 : vector<2x8xf32>
    %24 = vector.shape_cast %23 : vector<2x8xf32> to vector<2x8x1xf32>
    %25 = vector.broadcast %24 : vector<2x8x1xf32> to vector<2x8x32xf32>
    %26 = arith.mulf %0, %25 : vector<2x8x32xf32>
    %cst_11 = arith.constant dense<0.000000e+00> : vector<2x32xf32>
    %27 = vector.multi_reduction <add>, %26, %cst_11 [1] : vector<2x8x32xf32> to vector<2x32xf32>
    %c0_12 = arith.constant 0 : index
    %c0_13 = arith.constant 0 : index
    %28 = vector.load %arg5[%c0_12, %c0_13] : memref<2x32xf32, #tpu.memory_space<vmem>>, vector<2x32xf32>
    tpu.vector_store %arg5[%c0_12, %c0_13], %27 {strides = array<i32>} : memref<2x32xf32, #tpu.memory_space<vmem>>, vector<2x32xf32>,
    %c0_14 = arith.constant 0 : index
    %c0_15 = arith.constant 0 : index
    %29 = vector.load %arg6[%c0_14, %c0_15] : memref<2x8xf32, #tpu.memory_space<vmem>>, vector<2x8xf32>
    tpu.vector_store %arg6[%c0_14, %c0_15], %23 {strides = array<i32>} : memref<2x8xf32, #tpu.memory_space<vmem>>, vector<2x8xf32>,
    return
  }
  func.func @transform_0(%arg0: i32) -> (i32, i32, i32) {
    %c0_i32 = arith.constant 0 : i32
    %c0_i32_0 = arith.constant 0 : i32
    %c0_i32_1 = arith.constant 0 : i32
    return %arg0, %c0_i32, %c0_i32_0 : i32, i32, i32
  }
  func.func @transform_1(%arg0: i32) -> (i32, i32) {
    %c0_i32 = arith.constant 0 : i32
    %c0_i32_0 = arith.constant 0 : i32
    %c0_i32_1 = arith.constant 0 : i32
    return %c0_i32, %c0_i32_0 : i32, i32
  }
  func.func @transform_2(%arg0: i32) -> (i32, i32) {
    %c0_i32 = arith.constant 0 : i32
    %c0_i32_0 = arith.constant 0 : i32
    %c0_i32_1 = arith.constant 0 : i32
    return %c0_i32, %c0_i32_0 : i32, i32
  }
  func.func @transform_3(%arg0: i32) -> (i32, i32) {
    %c0_i32 = arith.constant 0 : i32
    %c0_i32_0 = arith.constant 0 : i32
    %c0_i32_1 = arith.constant 0 : i32
    return %c0_i32, %c0_i32_0 : i32, i32
  }
  func.func @transform_4(%arg0: i32) -> (i32, i32) {
    %c0_i32 = arith.constant 0 : i32
    %c0_i32_0 = arith.constant 0 : i32
    return %arg0, %c0_i32 : i32, i32
  }
  func.func @transform_5(%arg0: i32) -> (i32, i32) {
    %c0_i32 = arith.constant 0 : i32
    %c0_i32_0 = arith.constant 0 : i32
    return %arg0, %c0_i32 : i32, i32
  }
}

</mosaic_0001>

<bundles_post_ra>
// kernel: tpu_custom_call.1
= control target key start
LH: loop header
LB: loop body
LE: loop exit
PB: predicated region body
PF: predicated region fallthrough
CT: control target
= control target key end

     0   :  { %11 = vsyncpa [#allocation3], 0  ;;  %s453_s0 = inlined_call_operand.hbm [shape: f32[2,8,32], index: 0, kind: input, shape index: {}]   ;;  %s454_s1 = inlined_call_operand.hbm [shape: f32[32,64], index: 1, kind: input, shape index: {}]   ;;  %s455_s2 = inlined_call_operand.vmem [shape: f32[1,64], index: 2, kind: input, shape index: {}]   ;;  %s456_s3 = inlined_call_operand.vmem [shape: f32[1,64], index: 3, kind: input, shape index: {}]   ;;  %s457_s4 = inlined_call_operand.hbm [shape: f32[2,32], index: 4, kind: output, shape index: {0}]   ;;  %s458_s5 = inlined_call_operand.hbm [shape: f32[2,8], index: 5, kind: output, shape index: {1}]  }
   0x1   :  { %12 = vsyncpa [#allocation6], 0 }
   0x2   :  { %13 = vsyncpa [#allocation4], 0 }
   0x3   :  { %14 = vsyncpa [#allocation9], 0  ;;  %s19_s20 = sshll.u32 %s453_s0, 4  ;;  %s371_s21 = smov [#allocation2]   ;;  %s20_s20 = int_to_ptr.hbm [resolvable:$true] %s19_s20 }
   0x4   :  { %s21_s22 = sshll.u32 %s371_s21, 4  ;;  %s32_s25 = sshll.u32 %s454_s1, 4  ;;  %s22_s22 = int_to_ptr.vmem [resolvable:$true] %s21_s22  ;;  %s33_s25 = int_to_ptr.hbm [resolvable:$true] %s32_s25 }
   0x5   :  { %s372_s26 = smov 128   ;;  %s373_s27 = smov 8  }
   0x6   :  { %27 = dma.hbm_to_vmem [thread:$0]  %s20_s20, 256, %s22_s22, [#allocation3], %s372_s26, %s372_s26, %s373_s27  }
   0x7   :  { %s374_s28 = smov [#allocation5]  }
   0x8   :  { %s34_s29 = sshll.u32 %s374_s28, 4  ;;  %s35_s29 = int_to_ptr.vmem [resolvable:$true] %s34_s29 }
   0x9   :  { %40 = dma.hbm_to_vmem [thread:$0]  %s33_s25, 512, %s35_s29, [#allocation6], %s372_s26, %s372_s26, %s373_s27  }
   0xa   :  { %363 = dma.done.wait [#allocation3], 256  }
   0xb   :  { %364 = vsyncadd [#allocation3], 4294967040 }
   0xc   :  { %365 = dma.done.wait [#allocation6], 512  }
   0xd   :  { %366 = vsyncadd [#allocation6], 4294966784  ;;  %v58_v0 = vld [vmem:[#allocation5 + $0x18] sm:$0xff]  ;;  %v57_v1 = vld [vmem:[#allocation5 + $0x10] sm:$0xff]  ;;  %vm63_vm0 = vcmask 261120   ;;  %vm101_vm1 = vcmask 523264   ;;  %v110_v19 = vlaneseq }
   0xe   :  { %82 = vmatpush.msra.mxu0 %v58_v0  ;;  %241 = vmatpush.msra.mxu1 %v58_v0  ;;  %v56_v2 = vld [vmem:[#allocation5 + $0x8] sm:$0xff]  ;;  %v55_v3 = vld [vmem:[#allocation5] sm:$0xff]  ;;  %v414_v4 = vld [vmem:[#allocation2] sm:$0xff]  ;;  %vm114_vm2 = vcmask 1041409   ;;  %vm117_vm3 = vcmask 58368   ;;  %v375_v26 = vmov 0  }
   0xf   :  { %v416_v5 = vld [vmem:[#allocation2 + $0x8] sm:$0xff]  ;;  %v255_v6 = vld [vmem:[%s455_s2] ss:$0 sm:$0xff]  ;;  %v428_v20 = vand.u32 127, %v110_v19  ;;  %253 = vset.pattern.permute.xlu2 %v375_v26  ;;  %252 = vset.pattern.permute.xlu1 %v375_v26  ;;  %s376_s2 = smov [#allocation8]   ;;  %s223_s9 = sshll.u32 %s458_s5, 4  ;;  %s224_s9 = int_to_ptr.hbm [resolvable:$true] %s223_s9 }
  0x10   :  { %83 = vmatpush.msra.mxu0 %v57_v1  ;;  %242 = vmatpush.msra.mxu1 %v57_v1  ;;  %v256_v11 = vld [vmem:[%s456_s3] ss:$0 sm:$0xff]  ;;  %s221_s3 = sshll.u32 %s376_s2, 4  ;;  %s377_s5 = smov [#allocation7]   ;;  %vm198_vm8 = vcmask 254976   ;;  %s222_s3 = int_to_ptr.vmem [resolvable:$true] %s221_s3 }
  0x11   :  { %254 = vset.pattern.permute.xlu0 %v375_v26  ;;  %s210_s10 = sshll.u32 %s377_s5, 4  ;;  %s212_s13 = sshll.u32 %s457_s4, 4  ;;  %s211_s10 = int_to_ptr.vmem [resolvable:$true] %s210_s10  ;;  %s213_s13 = int_to_ptr.hbm [resolvable:$true] %s212_s13 }
  0x12   :  { %84 = vmatpush.msra.mxu0 %v56_v2  ;;  %243 = vmatpush.msra.mxu1 %v56_v2 }
  0x14   :  { %85 = vmatpush.msra.mxu0 %v55_v3  ;;  %244 = vmatpush.msra.mxu1 %v55_v3 }
  0x15   :  { %239 = vmatmul.msk.f32.vlgmr.msra.gmra.mxu0 %vm63_vm0, %v414_v4  ;;  %240 = vmatmul.msk.f32.vlgmr.msra.gmra.mxu1 %vm63_vm0, %v416_v5 }
  0x92   :  { %v87_v7 = vpop.f32.mrf.mxu0  ;;  %v90_v8 = vpop.f32.mrf.mxu1 }
  0x93   :  { %v88_v9 = vadd.f32 %v255_v6, %v87_v7  ;;  %v91_v10 = vadd.f32 %v255_v6, %v90_v8 }
  0x95   :  { %257 = vtanh.f32 %v88_v9 }
  0x96   :  { %259 = vtanh.f32 %v91_v10 }
  0x9b   :  { %v258_v12 = vpop.eup %257 }
  0x9c   :  { %v99_v13 = vmul.f32 %v258_v12, %v256_v11  ;;  %v260_v14 = vpop.eup %259 }
  0x9d   :  { %v100_v16 = vmul.f32 %v260_v14, %v256_v11 }
  0x9e   :  { %v102_v15 = vsel %vm101_vm1, %v99_v13, 0.0 }
  0x9f   :  { %103 = vadd.xlane.f32.xlu0 %v102_v15  ;;  %v105_v17 = vsel %vm101_vm1, %v100_v16, 0.0 }
  0xa7   :  { %106 = vadd.xlane.f32.xlu0 %v105_v17 }
 0x112   :  { %v104_v18 = vpop.xlane.xlu0 %103 }
 0x113   :  { %v112_v22 = vperm.slane %v104_v18, %v428_v20 }
 0x11a   :  { %v107_v21 = vpop.xlane.xlu0 %106 }
 0x11b   :  { %v113_v23 = vperm.slane %v107_v21, %v428_v20 }
 0x11d   :  { %v115_v24 = vsel %vm114_vm2, %v113_v23, %v112_v22 }
 0x11e   :  { %v118_v25 = vsel %vm117_vm3, %v115_v24, -inf }
 0x11f   :  { %119 = vmax.xlane.f32.xlu1 %v118_v25 }
 0x192   :  { %v120_v27 = vpop.xlane.xlu1 %119 }
 0x193   :  { %v122_v28 = vperm.slane %v120_v27, 0  ;;  %v123_v29 = vperm.slane %v120_v27, 1 }
 0x195   :  { %v126_v30 = vsub.f32 %v104_v18, %v122_v28  ;;  %v127_v31 = vsub.f32 %v107_v21, %v123_v29 }
 0x197   :  { %v128_v32 = vmul.f32 1.442695, %v126_v30  ;;  %v130_v33 = vmul.f32 1.442695, %v127_v31 }
 0x199   :  { %261 = vpow2.f32 %v128_v32 }
 0x19a   :  { %263 = vpow2.f32 %v130_v33 }
 0x19f   :  { %v262_v34 = vpop.eup %261 }
 0x1a0   :  { %v264_v35 = vpop.eup %263  ;;  %135 = vperm.xlu1 %252, %v262_v34  }
 0x1a1   :  { %138 = vperm.xlu2 %253, %v264_v35  }
 0x1fb   :  { %v139_v36 = vpop.permute.xlu2 %138 }
 0x1fc   :  { %v141_v38 = vperm.slane %v139_v36, %v428_v20 }
 0x212   :  { %v136_v37 = vpop.permute.xlu1 %135 }
 0x213   :  { %v140_v39 = vperm.slane %v136_v37, %v428_v20 }
 0x215   :  { %v142_v40 = vsel %vm114_vm2, %v141_v38, %v140_v39 }
 0x216   :  { %v144_v41 = vsel %vm117_vm3, %v142_v40, 0.0 }
 0x217   :  { %145 = vadd.xlane.f32.xlu2 %v144_v41 }
 0x28a   :  { %v146_v42 = vpop.xlane.xlu2 %145 }
 0x28b   :  { %265 = vrcp.f32 %v146_v42  ;;  %v158_v46 = vand.u32 2147483648, %v146_v42  ;;  %v156_v48 = vand.u32 2147483647, %v146_v42  ;;  %vm152_vm5 = vweird.f32 %v146_v42 }
 0x28d   :  { %v159_v50 = vor.u32 1.1754944e-38, %v158_v46  ;;  %vm157_vm7 = vcmp.eq.f32.partialorder %v156_v48, 8.507059e+37 }
 0x291   :  { %v266_v43 = vpop.eup %265 }
 0x292   :  { %v148_v44 = vmul.f32 %v266_v43, %v146_v42  ;;  %vm153_vm4 = vweird.f32 %v266_v43 }
 0x293   :  { %vm154_vm6 = vmor %vm152_vm5, %vm153_vm4 }
 0x294   :  { %v149_v45 = vsub.f32 1.0, %v148_v44 }
 0x296   :  { %v150_v47 = vmul.f32 %v266_v43, %v149_v45 }
 0x298   :  { %v151_v49 = vadd.f32 %v266_v43, %v150_v47 }
 0x29a   :  { %v155_v51 = vsel %vm154_vm6, %v266_v43, %v151_v49 }
 0x29b   :  { %v160_v52 = vsel %vm157_vm7, %v159_v50, %v155_v51 }
 0x29c   :  { %v163_v53 = vperm.slane %v160_v52, 1  ;;  %v162_v54 = vperm.slane %v160_v52, 0 }
 0x29e   :  { %v167_v55 = vmul.f32 %v264_v35, %v163_v53  ;;  %v166_v56 = vmul.f32 %v262_v34, %v162_v54 }
 0x2a0   :  { %175 = vperm.xlu1 %252, %v167_v55   ;;  %170 = vperm.xlu0 %254, %v166_v56  }
 0x312   :  { %v176_v57 = vpop.permute.xlu1 %175  ;;  %v171_v58 = vpop.permute.xlu0 %170 }
 0x313   :  { %v179_v59 = vmul.f32 %v176_v57, %v416_v5  ;;  %v201_v60 = vperm.slane %v176_v57, %v428_v20  ;;  %v178_v61 = vmul.f32 %v171_v58, %v414_v4  ;;  %v200_v62 = vperm.slane %v171_v58, %v428_v20 }
 0x315   :  { %v187_v63 = vsel %vm63_vm0, %v179_v59, 0.0  ;;  %v180_v0 = vsel %vm63_vm0, %v178_v61, 0.0  ;;  %v202_v1 = vsel %vm114_vm2, %v201_v60, %v200_v62 }
 0x316   :  { %v188_v2 = vrot.slane %v187_v63, 4  ;;  %v181_v3 = vrot.slane %v180_v0, 4  ;;  %204 = vst.msk [vmem:[#allocation8] sm:$0x3] %vm117_vm3, %v202_v1 }
 0x317   :  { %226 = dma.vmem_to_hbm [thread:$0]  %s222_s3, 32, %s224_s9, [#allocation9]  }
 0x318   :  { %v189_v5 = vadd.f32 %v188_v2, %v187_v63  ;;  %v182_v6 = vadd.f32 %v181_v3, %v180_v0 }
 0x31a   :  { %v190_v7 = vrot.slane %v189_v5, 2  ;;  %v183_v8 = vrot.slane %v182_v6, 2 }
 0x31c   :  { %v191_v4 = vadd.f32 %v190_v7, %v189_v5  ;;  %v184_v9 = vadd.f32 %v183_v8, %v182_v6 }
 0x31e   :  { %v192_v10 = vrot.slane %v191_v4, 1  ;;  %v185_v11 = vrot.slane %v184_v9, 1 }
 0x320   :  { %v193_v12 = vadd.f32 %v192_v10, %v191_v4  ;;  %v186_v13 = vadd.f32 %v185_v11, %v184_v9 }
 0x322   :  { %v196_v14 = vsel %vm114_vm2, %v193_v12, %v186_v13 }
 0x323   :  { %199 = vst.msk [vmem:[#allocation7] sm:$0x3] %vm198_vm8, %v196_v14 }
 0x324   :  { %215 = dma.vmem_to_hbm [thread:$0]  %s211_s10, 32, %s213_s13, [#allocation4]  }
 0x325   :  { %367 = dma.done.wait [#allocation4], 32  }
 0x326   :  { %368 = vsyncadd [#allocation4], 4294967264 }
 0x327   :  { %369 = dma.done.wait [#allocation9], 32  }
 0x328   :  { %370 = vsyncadd [#allocation9], 4294967264 }
 0x329   :  { %235 = vsyncpa [#allocation3], 1 }
 0x32a   :  { %236 = vsyncpa [#allocation6], 1 }
 0x32b   :  { %237 = vsyncpa [#allocation4], 1 }
 0x32c   :  { %238 = vsyncpa [#allocation9], 1 }

</bundles_post_ra>
